<compile_context>
chip_gen: v5e
topology: v5e:2x2
jax: 0.10.0
libtpu: 0.0.40
codegen_flags: <defaults>
</compile_context>

<pallas_src>
import jax
import jax.numpy as jnp
from jax.experimental import pallas as pl
from jax.experimental.pallas import tpu as pltpu


def channel_attention_kernel(p_ref, wcT_ref, bc_ref, w1T_ref, b1_ref,
                             w2T_ref, b2_ref, o_ref):
  """One batch element per grid step, channels-first (lane-dense) layout.

  p_ref  : (1, 9C, HW)  im2col patches (tap-major over rows), lanes = HW
  wcT_ref: (C, 9C)      conv weight, [Cout, tap*Cin]
  bc_ref : (C, 1)       conv bias (column)
  w1T_ref: (hid, C), b1_ref: (hid, 1)   fc1 (transposed)
  w2T_ref: (C, hid), b2_ref: (C, 1)     fc2 (transposed)
  o_ref  : (1, C, HW)   attended activations
  """
  patches = p_ref[0]                                     # (9C, HW)

  # ---- 3x3 conv as a single fused MXU matmul: (C,9C)@(9C,HW) ----
  act = jnp.dot(wcT_ref[...], patches,
                preferred_element_type=jnp.float32)      # (C, HW), f32 acc
  act = jnp.maximum(act + bc_ref[...], 0.0)              # bias + ReLU, dense lanes

  # ---- global average / max pooling over the spatial (lane) axis ----
  y_avg = jnp.mean(act, axis=1, keepdims=True)           # (C, 1)
  y_max = jnp.max(act, axis=1, keepdims=True)            # (C, 1)

  # Stack [avg | max] into (C, 2) and run the shared MLP ONCE.
  C = act.shape[0]
  col = jax.lax.broadcasted_iota(jnp.int32, (C, 2), 1)
  y2 = jnp.where(col == 0, y_avg, y_max)                 # (C, 2)

  h = jnp.dot(w1T_ref[...], y2,
              preferred_element_type=jnp.float32) + b1_ref[...]   # (hid, 2)
  h = jnp.maximum(h, 0.0)
  o = jnp.dot(w2T_ref[...], h,
              preferred_element_type=jnp.float32) + b2_ref[...]   # (C, 2)
  o = jax.nn.sigmoid(o)

  # weights = sigmoid(fc(avg) + fc(max))  (double sigmoid, as in PyTorch)
  wgt = jax.nn.sigmoid(o[:, 0:1] + o[:, 1:2])            # (C, 1)

  # ---- channel-wise rescale; (C, HW) store is fully lane-dense ----
  o_ref[0] = act * wgt


def channel_attention(x_nchw, params, *, matmul_dtype=jnp.float32):
  """params = (wc (9,C,C) tap-major [Cin,Cout], bc (1,C),
               w1 (C,hid), b1 (1,hid), w2 (hid,C), b2 (1,C)).

  Set matmul_dtype=jnp.bfloat16 on v5e for 2x conv-matmul throughput
  (accumulation stays f32)."""
  B, C, H, W = x_nchw.shape
  wc, bc, w1, b1, w2, b2 = params
  hidden = w1.shape[1]
  HW = H * W

  # ---- parameter relayout for the channels-first kernel ----
  wcT = jnp.transpose(wc, (2, 0, 1)).reshape(C, 9 * C)   # [Cout, tap*Cin]
  bcT = bc.reshape(C, 1).astype(jnp.float32)
  w1T = w1.T.astype(jnp.float32)                         # (hid, C)
  b1T = b1.reshape(hidden, 1).astype(jnp.float32)
  w2T = w2.T.astype(jnp.float32)                         # (C, hid)
  b2T = b2.reshape(C, 1).astype(jnp.float32)

  # ---- im2col in the wrapper (one-time HBM pass, no in-kernel relayouts) ----
  x = x_nchw.astype(jnp.float32)
  xp = jnp.pad(x, ((0, 0), (0, 0), (1, 1), (1, 1)))      # zero pad, padding=1
  slabs = [xp[:, :, kh:kh + H, kw:kw + W]                # each (B, C, H, W)
           for kh in range(3) for kw in range(3)]
  patches = jnp.stack(slabs, axis=1).reshape(B, 9 * C, HW)   # (B, 9C, HW)

  patches = patches.astype(matmul_dtype)
  wcT = wcT.astype(matmul_dtype)

  out = pl.pallas_call(
      channel_attention_kernel,
      out_shape=jax.ShapeDtypeStruct((B, C, HW), jnp.float32),
      grid_spec=pltpu.PrefetchScalarGridSpec(
          num_scalar_prefetch=0,
          grid=(B,),
          in_specs=[
              pl.BlockSpec((1, 9 * C, HW), lambda b: (b, 0, 0)),
              pl.BlockSpec((C, 9 * C), lambda b: (0, 0)),
              pl.BlockSpec((C, 1), lambda b: (0, 0)),
              pl.BlockSpec((hidden, C), lambda b: (0, 0)),
              pl.BlockSpec((hidden, 1), lambda b: (0, 0)),
              pl.BlockSpec((C, hidden), lambda b: (0, 0)),
              pl.BlockSpec((C, 1), lambda b: (0, 0)),
          ],
          out_specs=pl.BlockSpec((1, C, HW), lambda b: (b, 0, 0)),
      ),
      compiler_params=pltpu.CompilerParams(
          dimension_semantics=("parallel",)),
  )(patches, wcT, bcT, w1T, b1T, w2T, b2T)

  return out.reshape(B, C, H, W)                         # already NCHW


def reference(x_nchw, params):
  """Pure-JAX reference with identical semantics (for validation)."""
  wc, bc, w1, b1, w2, b2 = params
  B, C, H, W = x_nchw.shape
  x_nhwc = jnp.transpose(x_nchw, (0, 2, 3, 1))
  wk = wc.reshape(3, 3, C, C)                            # HWIO
  conv = jax.lax.conv_general_dilated(
      x_nhwc, wk, window_strides=(1, 1), padding="SAME",
      dimension_numbers=("NHWC", "HWIO", "NHWC"))
  act = jax.nn.relu(conv + bc.reshape(1, 1, 1, C))
  y_avg = act.mean(axis=(1, 2))
  y_max = act.max(axis=(1, 2))

  def fc(v):
    h = jax.nn.relu(v @ w1 + b1)
    return jax.nn.sigmoid(h @ w2 + b2)

  wgt = jax.nn.sigmoid(fc(y_avg) + fc(y_max))
  out = act * wgt[:, None, None, :]
  return jnp.transpose(out, (0, 3, 1, 2))


if __name__ == "__main__":
  # TODO(synk): the full pretrained torchvision resnet34 backbone (BatchNorm
  # running stats + 16 BasicBlocks) is not reproduced in-script; this kernel
  # implements the ChannelAttention conv+pool+MLP+rescale block that the
  # performance review targeted.
  B, C, H, W = 2, 32, 16, 16
  reduction = 16
  hidden = C // reduction  # = 2

  key = jax.random.PRNGKey(0)
  ks = jax.random.split(key, 7)
  x = jax.random.normal(ks[0], (B, C, H, W), jnp.float32)

  # Deterministic synthetic parameters (conv weight stored tap-major [Cin,Cout];
  # Linear weights stored so y = x @ W + b).
  wc = 0.1 * jax.random.normal(ks[1], (9, C, C), jnp.float32)
  bc = 0.1 * jax.random.normal(ks[2], (1, C), jnp.float32)
  w1 = 0.1 * jax.random.normal(ks[3], (C, hidden), jnp.float32)
  b1 = 0.1 * jax.random.normal(ks[4], (1, hidden), jnp.float32)
  w2 = 0.1 * jax.random.normal(ks[5], (hidden, C), jnp.float32)
  b2 = 0.1 * jax.random.normal(ks[6], (1, C), jnp.float32)
  params = (wc, bc, w1, b1, w2, b2)

  out = jax.block_until_ready(channel_attention(x, params))
  ref = jax.block_until_ready(reference(x, params))
  assert out.shape == (B, C, H, W)
  err = float(jnp.max(jnp.abs(out - ref)))
  assert jnp.allclose(out, ref, rtol=1e-3, atol=1e-3), err
  print("KERNEL_OK")
</pallas_src>

<mosaic_0001>
module attributes {stable_mosaic.version = 11 : i64} {
  func.func @channel_attention_kernel(%arg0: i32, %arg1: memref<1x288x256xf32, #tpu.memory_space<vmem>>, %arg2: memref<32x288xf32, #tpu.memory_space<vmem>>, %arg3: memref<32x1xf32, #tpu.memory_space<vmem>>, %arg4: memref<2x32xf32, #tpu.memory_space<vmem>>, %arg5: memref<2x1xf32, #tpu.memory_space<vmem>>, %arg6: memref<32x2xf32, #tpu.memory_space<vmem>>, %arg7: memref<32x1xf32, #tpu.memory_space<vmem>>, %arg8: memref<1x32x256xf32, #tpu.memory_space<vmem>>) attributes {dimension_semantics = [#tpu.dimension_semantics<parallel>], iteration_bounds = array<i64: 2>, scalar_prefetch = 0 : i64, scratch_operands = 0 : i64, tpu.core_type = #tpu.core_type<tc>, window_params = [{transform_indices = @transform_0, window_bounds = array<i64: 1, 288, 256>}, {pipeline_mode = #tpu.pipeline_mode<synchronous>, transform_indices = @transform_1, window_bounds = array<i64: 32, 288>}, {pipeline_mode = #tpu.pipeline_mode<synchronous>, transform_indices = @transform_2, window_bounds = array<i64: 32, 1>}, {pipeline_mode = #tpu.pipeline_mode<synchronous>, transform_indices = @transform_3, window_bounds = array<i64: 2, 32>}, {pipeline_mode = #tpu.pipeline_mode<synchronous>, transform_indices = @transform_4, window_bounds = array<i64: 2, 1>}, {pipeline_mode = #tpu.pipeline_mode<synchronous>, transform_indices = @transform_5, window_bounds = array<i64: 32, 2>}, {pipeline_mode = #tpu.pipeline_mode<synchronous>, transform_indices = @transform_6, window_bounds = array<i64: 32, 1>}, {transform_indices = @transform_7, window_bounds = array<i64: 1, 32, 256>}]} {
    %c0 = arith.constant 0 : index
    %c0_0 = arith.constant 0 : index
    %c0_1 = arith.constant 0 : index
    %0 = vector.load %arg1[%c0, %c0_0, %c0_1] : memref<1x288x256xf32, #tpu.memory_space<vmem>>, vector<1x288x256xf32>
    %1 = vector.shape_cast %0 : vector<1x288x256xf32> to vector<288x256xf32>
    %c0_2 = arith.constant 0 : index
    %c0_3 = arith.constant 0 : index
    %2 = vector.load %arg2[%c0_2, %c0_3] : memref<32x288xf32, #tpu.memory_space<vmem>>, vector<32x288xf32>
    %cst = arith.constant dense<0.000000e+00> : vector<32x256xf32>
    %3 = tpu.matmul %2, %1, %cst {dimension_numbers = #tpu.dot_dimension_numbers<[1], [0], [0], [1], [0, 0, 1, 1], [], []>} : vector<32x288xf32>, vector<288x256xf32>, vector<32x256xf32> -> vector<32x256xf32>
    %c0_4 = arith.constant 0 : index
    %c0_5 = arith.constant 0 : index
    %4 = vector.load %arg3[%c0_4, %c0_5] : memref<32x1xf32, #tpu.memory_space<vmem>>, vector<32x1xf32>
    %5 = vector.broadcast %4 : vector<32x1xf32> to vector<32x256xf32>
    %6 = arith.addf %3, %5 : vector<32x256xf32>
    %cst_6 = arith.constant 0.000000e+00 : f32
    %7 = vector.broadcast %cst_6 : f32 to vector<32x256xf32>
    %8 = arith.maximumf %6, %7 : vector<32x256xf32>
    %cst_7 = arith.constant dense<0.000000e+00> : vector<32xf32>
    %9 = vector.multi_reduction <add>, %8, %cst_7 [1] : vector<32x256xf32> to vector<32xf32>
    %10 = vector.shape_cast %9 : vector<32xf32> to vector<32x1xf32>
    %cst_8 = arith.constant 2.560000e+02 : f32
    %11 = vector.broadcast %cst_8 : f32 to vector<32x1xf32>
    %12 = arith.divf %10, %11 : vector<32x1xf32>
    %cst_9 = arith.constant dense<0xFF800000> : vector<32xf32>
    %13 = vector.multi_reduction <maximumf>, %8, %cst_9 [1] : vector<32x256xf32> to vector<32xf32>
    %14 = vector.shape_cast %13 : vector<32xf32> to vector<32x1xf32>
    %15 = tpu.iota {dimensions = array<i32: 1>} : vector<32x2xi32>
    %c0_i32 = arith.constant 0 : i32
    %16 = vector.broadcast %c0_i32 : i32 to vector<32x2xi32>
    %17 = arith.cmpi eq, %15, %16 : vector<32x2xi32>
    %18 = vector.shape_cast %12 : vector<32x1xf32> to vector<32x1xf32>
    %19 = vector.broadcast %18 : vector<32x1xf32> to vector<32x2xf32>
    %20 = vector.shape_cast %14 : vector<32x1xf32> to vector<32x1xf32>
    %21 = vector.broadcast %20 : vector<32x1xf32> to vector<32x2xf32>
    %22 = arith.select %17, %19, %21 : vector<32x2xi1>, vector<32x2xf32>
    %c0_10 = arith.constant 0 : index
    %c0_11 = arith.constant 0 : index
    %23 = vector.load %arg4[%c0_10, %c0_11] : memref<2x32xf32, #tpu.memory_space<vmem>>, vector<2x32xf32>
    %cst_12 = arith.constant dense<0.000000e+00> : vector<2x2xf32>
    %24 = tpu.matmul %23, %22, %cst_12 {dimension_numbers = #tpu.dot_dimension_numbers<[1], [0], [0], [1], [0, 0, 1, 1], [], []>} : vector<2x32xf32>, vector<32x2xf32>, vector<2x2xf32> -> vector<2x2xf32>
    %c0_13 = arith.constant 0 : index
    %c0_14 = arith.constant 0 : index
    %25 = vector.load %arg5[%c0_13, %c0_14] : memref<2x1xf32, #tpu.memory_space<vmem>>, vector<2x1xf32>
    %26 = vector.broadcast %25 : vector<2x1xf32> to vector<2x2xf32>
    %27 = arith.addf %24, %26 : vector<2x2xf32>
    %cst_15 = arith.constant 0.000000e+00 : f32
    %28 = vector.broadcast %cst_15 : f32 to vector<2x2xf32>
    %29 = arith.maximumf %27, %28 : vector<2x2xf32>
    %c0_16 = arith.constant 0 : index
    %c0_17 = arith.constant 0 : index
    %30 = vector.load %arg6[%c0_16, %c0_17] : memref<32x2xf32, #tpu.memory_space<vmem>>, vector<32x2xf32>
    %cst_18 = arith.constant dense<0.000000e+00> : vector<32x2xf32>
    %31 = tpu.matmul %30, %29, %cst_18 {dimension_numbers = #tpu.dot_dimension_numbers<[1], [0], [0], [1], [0, 0, 1, 1], [], []>} : vector<32x2xf32>, vector<2x2xf32>, vector<32x2xf32> -> vector<32x2xf32>
    %c0_19 = arith.constant 0 : index
    %c0_20 = arith.constant 0 : index
    %32 = vector.load %arg7[%c0_19, %c0_20] : memref<32x1xf32, #tpu.memory_space<vmem>>, vector<32x1xf32>
    %33 = vector.broadcast %32 : vector<32x1xf32> to vector<32x2xf32>
    %34 = arith.addf %31, %33 : vector<32x2xf32>
    %35 = arith.negf %34 : vector<32x2xf32>
    %36 = math.exp %35 : vector<32x2xf32>
    %cst_21 = arith.constant 1.000000e+00 : f32
    %37 = vector.broadcast %cst_21 : f32 to vector<32x2xf32>
    %38 = arith.addf %37, %36 : vector<32x2xf32>
    %39 = arith.divf %37, %38 : vector<32x2xf32>
    %40 = vector.extract_strided_slice %39 {offsets = [0, 0], sizes = [32, 1], strides = [1, 1]} : vector<32x2xf32> to vector<32x1xf32>
    %41 = vector.extract_strided_slice %39 {offsets = [0, 1], sizes = [32, 1], strides = [1, 1]} : vector<32x2xf32> to vector<32x1xf32>
    %42 = arith.addf %40, %41 : vector<32x1xf32>
    %43 = arith.negf %42 : vector<32x1xf32>
    %44 = math.exp %43 : vector<32x1xf32>
    %cst_22 = arith.constant 1.000000e+00 : f32
    %45 = vector.broadcast %cst_22 : f32 to vector<32x1xf32>
    %46 = arith.addf %45, %44 : vector<32x1xf32>
    %47 = arith.divf %45, %46 : vector<32x1xf32>
    %48 = vector.broadcast %47 : vector<32x1xf32> to vector<32x256xf32>
    %49 = arith.mulf %8, %48 : vector<32x256xf32>
    %c0_23 = arith.constant 0 : index
    %c0_24 = arith.constant 0 : index
    %c0_25 = arith.constant 0 : index
    %50 = vector.load %arg8[%c0_23, %c0_24, %c0_25] : memref<1x32x256xf32, #tpu.memory_space<vmem>>, vector<1x32x256xf32>
    %51 = vector.shape_cast %50 : vector<1x32x256xf32> to vector<32x256xf32>
    %52 = vector.shape_cast %49 : vector<32x256xf32> to vector<1x32x256xf32>
    tpu.vector_store %arg8[%c0_23, %c0_24, %c0_25], %52 {strides = array<i32>} : memref<1x32x256xf32, #tpu.memory_space<vmem>>, vector<1x32x256xf32>,
    return
  }
  func.func @transform_0(%arg0: i32) -> (i32, i32, i32) {
    %c0_i32 = arith.constant 0 : i32
    %c0_i32_0 = arith.constant 0 : i32
    %c0_i32_1 = arith.constant 0 : i32
    return %arg0, %c0_i32, %c0_i32_0 : i32, i32, i32
  }
  func.func @transform_1(%arg0: i32) -> (i32, i32) {
    %c0_i32 = arith.constant 0 : i32
    %c0_i32_0 = arith.constant 0 : i32
    %c0_i32_1 = arith.constant 0 : i32
    return %c0_i32, %c0_i32_0 : i32, i32
  }
  func.func @transform_2(%arg0: i32) -> (i32, i32) {
    %c0_i32 = arith.constant 0 : i32
    %c0_i32_0 = arith.constant 0 : i32
    %c0_i32_1 = arith.constant 0 : i32
    return %c0_i32, %c0_i32_0 : i32, i32
  }
  func.func @transform_3(%arg0: i32) -> (i32, i32) {
    %c0_i32 = arith.constant 0 : i32
    %c0_i32_0 = arith.constant 0 : i32
    %c0_i32_1 = arith.constant 0 : i32
    return %c0_i32, %c0_i32_0 : i32, i32
  }
  func.func @transform_4(%arg0: i32) -> (i32, i32) {
    %c0_i32 = arith.constant 0 : i32
    %c0_i32_0 = arith.constant 0 : i32
    %c0_i32_1 = arith.constant 0 : i32
    return %c0_i32, %c0_i32_0 : i32, i32
  }
  func.func @transform_5(%arg0: i32) -> (i32, i32) {
    %c0_i32 = arith.constant 0 : i32
    %c0_i32_0 = arith.constant 0 : i32
    %c0_i32_1 = arith.constant 0 : i32
    return %c0_i32, %c0_i32_0 : i32, i32
  }
  func.func @transform_6(%arg0: i32) -> (i32, i32) {
    %c0_i32 = arith.constant 0 : i32
    %c0_i32_0 = arith.constant 0 : i32
    %c0_i32_1 = arith.constant 0 : i32
    return %c0_i32, %c0_i32_0 : i32, i32
  }
  func.func @transform_7(%arg0: i32) -> (i32, i32, i32) {
    %c0_i32 = arith.constant 0 : i32
    %c0_i32_0 = arith.constant 0 : i32
    %c0_i32_1 = arith.constant 0 : i32
    return %arg0, %c0_i32, %c0_i32_0 : i32, i32, i32
  }
}

</mosaic_0001>

<bundles_post_ra>
// kernel: tpu_custom_call.1
= control target key start
LH: loop header
LB: loop body
LE: loop exit
PB: predicated region body
PF: predicated region fallthrough
CT: control target
= control target key end

     0   :  { %s1729_s0 = inlined_call_operand.hbm [shape: f32[2,288,256], index: 0, kind: input, shape index: {}]   ;;  %s1730_s1 = inlined_call_operand.hbm [shape: f32[32,288], index: 1, kind: input, shape index: {}]   ;;  %s1731_s2 = inlined_call_operand.vmem [shape: f32[32,1], index: 2, kind: input, shape index: {}]   ;;  %s1732_s3 = inlined_call_operand.vmem [shape: f32[2,32], index: 3, kind: input, shape index: {}]   ;;  %s1733_s4 = inlined_call_operand.vmem [shape: f32[2,1], index: 4, kind: input, shape index: {}]   ;;  %s1734_s5 = inlined_call_operand.vmem [shape: f32[32,2], index: 5, kind: input, shape index: {}]   ;;  %s1735_s6 = inlined_call_operand.vmem [shape: f32[32,1], index: 6, kind: input, shape index: {}]   ;;  %s1736_s7 = inlined_call_operand.hbm [shape: f32[2,32,256], index: 7, kind: output, shape index: {}]  }
   0x1   :  { %1738 = sst [smem:[#allocation13_spill]] %s1730_s1 }
   0x2   :  { %12 = vsyncpa [#allocation3], 0 }
   0x3   :  { %14 = vsyncpa [#allocation3 + $0x1], 0 }
   0x4   :  { %15 = vsyncpa [#allocation6], 0 }
   0x5   :  { %16 = vsyncpa [#allocation4], 0 }
   0x6   :  { %18 = vsyncpa [#allocation4 + $0x1], 0  ;;  %s1402_s24 = smov 0   ;;  %s1404_s25 = smov 0  }
   0x7   :  { %s1406_s26 = smov 0   ;;  %s1408_s27 = smov 0  }
   0x8 LB: > { %1739 = sst [smem:[#allocation11_spill]] %s1346_s26  ;;  %s1423_s28 = sadd.s32 4294967295, %s1350_s27   ;;  %s1350_s27 = sphi %s1408_s27, %s1752_s27   ;;  %s1346_s26 = sphi %s1406_s26, %s1749_s26   ;;  %s1342_s25 = sphi %s1404_s25, %s1751_s25   ;;  %s1338_s24 = sphi %s1402_s24, %s1750_s24  }
   0x9   : > { %s1073_s29 = sadd.s32 4294967294, %s1350_s27   ;;  %p44_p0 = scmp.ne.s32.totalorder %s1342_s25, %s1338_s24 }
   0xa   : > { %p45_p1 = scmp.eq.s32.totalorder %s1423_s28, 0  ;;  %p194_p2 = scmp.eq.s32.totalorder %s1423_s28, 1 }
   0xb   : > { %p200_p3 = scmp.eq.s32.totalorder %s1073_s29, 1  ;;  %p1074_p5 = scmp.ge.s32.totalorder %s1350_s27, 1 }
   0xc   : > { %p1432_p4 = por %p45_p1, %p44_p0  ;;  %p207_p7 = scmp.lt.s32.totalorder %s1350_s27, 3 }
   0xd   : > { %p1437_p6 = por %p200_p3, %p44_p0  ;;  %s1742_s1 = sld [smem:[#allocation13_spill]] }
   0xe   : > { %p1445_p8 = pnand %p1074_p5, %p207_p7  ;;  %s1352_s13 = smov [#allocation5]  }
   0xf   : > { %s220_s14 = sshll.u32 %s1352_s13, 4  ;;  %s1455_s15 = sadd.s32 1, %s1350_s27   ;;  %s221_s14 = int_to_ptr.vmem [resolvable:$true] %s220_s14 }
  0x10   : > { %p1125_p9 = pneg %p1445_p8  ;;  %s1353_s16 = smov 384  }
  0x11   : > { %s1354_s17 = smov 24   ;;  %s28_s18 = ssub.s32 %s1350_s27, %s1455_s15 }
  0x12   : > { %p1126_p10 = pnand %p1125_p9, %p45_p1  ;;  %s31_s19 = sadd.s32 1, %s1346_s26 }
  0x13   : > { %s218_s11 = sshll.u32 %s1742_s1, 4  ;;  %p29_p12 = scmp.eq.s32.totalorder %s28_s18, 0  ;;  %s219_s11 = int_to_ptr.hbm [resolvable:$true] %s218_s11 }
  0x14   : > { %1128 = dma.hbm_to_vmem [thread:$0]  (!%p1126_p10), %s219_s11, 1536, %s221_s14, [#allocation6], %s1353_s16, %s1353_s16, %s1354_s17  }
  0x15   : > { %p38_p13 = scmp.ne.s32.totalorder %s1346_s26, %s1342_s25  ;;  %p39_p0 = scmp.eq.s32.totalorder %s1350_s27, 0 }
  0x16   : > { %p1138_p3 = scmp.lt.s32.totalorder %s1350_s27, 2  ;;  %s249_s22 = sand.u32 1, %s1346_s26  }
  0x17   : > { %s1465_s20 = scalar_select %p29_p12, %s1346_s26, %s31_s19  }
  0x18   : > { %p40_p5 = por %p39_p0, %p38_p13  ;;  %p1469_p7 = por %p194_p2, %p38_p13 }
  0x19   : > { %1744 = sst [smem:[#allocation12_spill]] %s1465_s20  ;;  %s1115_s23 = smul.u32 576, %s1350_s27 }
  0x1a   : > { %s1114_s29 = smul.u32 576, %s249_s22  ;;  %p1478_p9 = pnand %p1138_p3, %p40_p5 }
  0x1b   : > { %s258_s11 = scalar_lea.hbm %s1729_s0, %s1115_s23  ;;  %s250_s18 = scalar_lea.sflag [#allocation3], %s249_s22 }
  0x1c   : > { %s259_s14 = sshll.u32 %s258_s11, 4  ;;  %s253_s16 = scalar_lea.vmem [#allocation2], %s1114_s29  ;;  %s260_s14 = int_to_ptr.hbm [resolvable:$true] %s259_s14 }
  0x1d   : > { %s261_s17 = sshll.u32 %s253_s16, 4  ;;  %s1250_s19 = sshra.s32 %s260_s14, 4  ;;  %s262_s17 = int_to_ptr.vmem [resolvable:$true] %s261_s17  ;;  %s1251_s19 = int_to_ptr.hbm [resolvable:$true] %s1250_s19 }
  0x1e   : > { %s1252_s1 = scalar_lea.hbm %s1251_s19, 576  ;;  %p1254_p10 = pneg %p1478_p9 }
  0x1f   : > { %p1253_p2 = scmp.ne.s32.totalorder %s1251_s19, %s1252_s1  ;;  %s1257_s10 = scalar_lea.hbm %s1729_s0, 1152 }
  0x20   : > { %p1258_p0 = scmp.lt.s32.totalorder %s1251_s19, %s1729_s0  ;;  %p1259_p3 = scmp.lt.s32.totalorder %s1257_s10, %s1252_s1 }
  0x21   : > { %p1255_p12 = pnand %p1254_p10, %p1253_p2 }
  0x22   : > { %p1260_p5 = por %p1259_p3, %p1258_p0 }
  0x23   : > { %p1256_p13 = pneg %p1255_p12 }
  0x25   : > { %p1261_p11 = pnand %p1260_p5, %p1256_p13 }
  0x27   : > { %1264 = shalt.err (!%p1261_p11)
}
  0x28   : > { %s1355_s22 = smov 256   ;;  %s1356_s29 = smov 16  }
  0x29   : > { %1132 = dma.hbm_to_vmem [thread:$0]  (!%p1478_p9), %s260_s14, 9216, %s262_s17, %s250_s18, %s1355_s22, %s1355_s22, %s1356_s29  }
  0x2a   : > { %273 = sbr.rel (%p1445_p8) target bundleno = 976 (0x3d0), region = 48  ;;  %s1495_s11 = sand.u32 (!%p1445_p8), 1, %s1342_s25  }
  0x2b   : > { %s1116_s26 = smul.u32 (!%p1445_p8), 576, %s1495_s11  ;;  %s276_s20 = scalar_lea.sflag (!%p1445_p8), [#allocation3], %s1495_s11 }
  0x2d   : > { %s1499_s1 = scalar_lea.vmem (!%p1445_p8), [#allocation2], %s1116_s26 }
  0x2f   : > { %1325 = dma.done.wait (%p1432_p4), %s276_s20, 9216  }
  0x30   : > { %1327 = vsyncadd (%p1432_p4), %s276_s20, 4294958080 }
  0x31   : > { %1329 = dma.done.wait (%p45_p1), [#allocation6], 1536  }
  0x32   : > { %1331 = vsyncadd (%p45_p1), [#allocation6], 4294965760  ;;  %v346_v0 = vld [vmem:[%s1499_s1 + $0xf0] sm:$0xff]  ;;  %v344_v2 = vld [vmem:[%s1499_s1 + $0xe0] sm:$0xff]  ;;  %vm424_vm0 = vcmask 261120   ;;  %vm733_vm3 = vcmask 1041408  }
  0x33   : > { %v386_v1 = vld [vmem:[%s1499_s1 + $0x230] sm:$0xff]  ;;  %437 = vmatpush.msra.mxu0 %v346_v0  ;;  %v384_v4 = vld [vmem:[%s1499_s1 + $0x220] sm:$0xff]  ;;  %v347_v9 = vld [vmem:[%s1499_s1 + $0xf8] sm:$0xff]  ;;  %vm720_vm4 = vcmask 15360   ;;  %s1359_s29 = smov 127   ;;  %s1080_s26 = sshll.u32 %s1495_s11, 6 }
  0x34   : > { %507 = vmatpush.msra.mxu2 %v386_v1  ;;  %v378_v3 = vld [vmem:[%s1499_s1 + $0x1f0] sm:$0xff]  ;;  %v376_v6 = vld [vmem:[%s1499_s1 + $0x1e0] sm:$0xff]  ;;  %524 = vmatpush.msra.mxu3 %v347_v9  ;;  %v345_v14 = vld [vmem:[%s1499_s1 + $0xe8] sm:$0xff]  ;;  %s315_s20 = scalar_lea.vmem [#allocation7], %s1080_s26  ;;  %s975_s17 = scalar_lea.sflag [#allocation4], %s1495_s11 }
  0x35   : > { %466 = vmatpush.msra.mxu1 %v378_v3  ;;  %v342_v5 = vld [vmem:[%s1499_s1 + $0xd0] sm:$0xff]  ;;  %438 = vmatpush.msra.mxu0 %v344_v2  ;;  %v340_v10 = vld [vmem:[%s1499_s1 + $0xc0] sm:$0xff]  ;;  %v379_v16 = vld [vmem:[%s1499_s1 + $0x1f8] sm:$0xff]  ;;  %s987_s14 = sshll.u32 %s315_s20, 4  ;;  %s1300_s9 = scalar_lea.hbm %s1736_s7, 128  ;;  %s988_s14 = int_to_ptr.vmem [resolvable:$true] %s987_s14 }
  0x36   : > { %v382_v7 = vld [vmem:[%s1499_s1 + $0x210] sm:$0xff]  ;;  %508 = vmatpush.msra.mxu2 %v384_v4  ;;  %v380_v11 = vld [vmem:[%s1499_s1 + $0x200] sm:$0xff]  ;;  %525 = vmatpush.msra.mxu3 %v345_v14  ;;  %v343_v18 = vld [vmem:[%s1499_s1 + $0xd8] sm:$0xff] }
  0x37   : > { %v374_v8 = vld [vmem:[%s1499_s1 + $0x1d0] sm:$0xff]  ;;  %467 = vmatpush.msra.mxu1 %v376_v6  ;;  %439 = vmatpush.msra.mxu0 %v342_v5  ;;  %v372_v13 = vld [vmem:[%s1499_s1 + $0x1c0] sm:$0xff]  ;;  %v377_v20 = vld [vmem:[%s1499_s1 + $0x1e8] sm:$0xff] }
  0x38   : > { %509 = vmatpush.msra.mxu2 %v382_v7  ;;  %v1521_v12 = vld [vmem:[#allocation5 + $0x10] sm:$0xff]  ;;  %v336_v19 = vld [vmem:[%s1499_s1 + $0xa0] sm:$0xff]  ;;  %v341_v22 = vld [vmem:[%s1499_s1 + $0xc8] sm:$0xff]  ;;  %526 = vmatpush.msra.mxu3 %v343_v18 }
  0x39   : > { %468 = vmatpush.msra.mxu1 %v374_v8  ;;  %v338_v15 = vld [vmem:[%s1499_s1 + $0xb0] sm:$0xff]  ;;  %440 = vmatpush.msra.mxu0 %v340_v10  ;;  %v368_v21 = vld [vmem:[%s1499_s1 + $0x1a0] sm:$0xff]  ;;  %v375_v24 = vld [vmem:[%s1499_s1 + $0x1d8] sm:$0xff]  ;;  %v1357_v8 = vmov 0  }
  0x3a   : > { %510 = vmatpush.msra.mxu2 %v380_v11  ;;  %v370_v17 = vld [vmem:[%s1499_s1 + $0x1b0] sm:$0xff]  ;;  %v339_v26 = vld [vmem:[%s1499_s1 + $0xb8] sm:$0xff]  ;;  %527 = vmatpush.msra.mxu3 %v341_v22  ;;  %v332_v27 = vld [vmem:[%s1499_s1 + $0x80] sm:$0xff] }
  0x3b   : > { %1081 = vmatmul.msk.f32.vlgmr.msra.gmra.mxu2 %vm424_vm0, %v1521_v12  ;;  %469 = vmatpush.msra.mxu1 %v372_v13  ;;  %v334_v23 = vld [vmem:[%s1499_s1 + $0x90] sm:$0xff]  ;;  %v373_v28 = vld [vmem:[%s1499_s1 + $0x1c8] sm:$0xff]  ;;  %v364_v30 = vld [vmem:[%s1499_s1 + $0x180] sm:$0xff] }
  0x3c   : > { %441 = vmatpush.msra.mxu0 %v338_v15  ;;  %553 = vmatpush.msrb.mxu2 %v379_v16  ;;  %v366_v25 = vld [vmem:[%s1499_s1 + $0x190] sm:$0xff]  ;;  %v1541_v29 = vld [vmem:[#allocation5 + $0x28] sm:$0xff]  ;;  %v371_v33 = vld [vmem:[%s1499_s1 + $0x1b8] sm:$0xff] }
  0x3d   : > { %470 = vmatpush.msra.mxu1 %v370_v17  ;;  %528 = vmatpush.msra.mxu3 %v339_v26  ;;  %v330_v31 = vld [vmem:[%s1499_s1 + $0x70] sm:$0xff]  ;;  %v337_v32 = vld [vmem:[%s1499_s1 + $0xa8] sm:$0xff]  ;;  %v328_v35 = vld [vmem:[%s1499_s1 + $0x60] sm:$0xff] }
  0x3e   : > { %442 = vmatpush.msra.mxu0 %v336_v19  ;;  %554 = vmatpush.msrb.mxu2 %v377_v20  ;;  %v362_v34 = vld [vmem:[%s1499_s1 + $0x170] sm:$0xff]  ;;  %v335_v36 = vld [vmem:[%s1499_s1 + $0x98] sm:$0xff]  ;;  %v369_v37 = vld [vmem:[%s1499_s1 + $0x1a8] sm:$0xff] }
  0x3f   : > { %471 = vmatpush.msra.mxu1 %v368_v21  ;;  %529 = vmatpush.msra.mxu3 %v337_v32  ;;  %v360_v38 = vld [vmem:[%s1499_s1 + $0x160] sm:$0xff]  ;;  %v326_v39 = vld [vmem:[%s1499_s1 + $0x50] sm:$0xff]  ;;  %v333_v40 = vld [vmem:[%s1499_s1 + $0x88] sm:$0xff] }
  0x40   : > { %443 = vmatpush.msra.mxu0 %v334_v23  ;;  %555 = vmatpush.msrb.mxu2 %v375_v24  ;;  %v367_v41 = vld [vmem:[%s1499_s1 + $0x198] sm:$0xff]  ;;  %v358_v42 = vld [vmem:[%s1499_s1 + $0x150] sm:$0xff]  ;;  %v324_v43 = vld [vmem:[%s1499_s1 + $0x40] sm:$0xff] }
  0x41   : > { %472 = vmatpush.msra.mxu1 %v366_v25  ;;  %530 = vmatpush.msra.mxu3 %v335_v36  ;;  %v331_v44 = vld [vmem:[%s1499_s1 + $0x78] sm:$0xff]  ;;  %v365_v45 = vld [vmem:[%s1499_s1 + $0x188] sm:$0xff]  ;;  %v356_v46 = vld [vmem:[%s1499_s1 + $0x140] sm:$0xff] }
  0x42   : > { %444 = vmatpush.msra.mxu0 %v332_v27  ;;  %556 = vmatpush.msrb.mxu2 %v373_v28  ;;  %v1562_v47 = vld [vmem:[#allocation5 + $0x40] sm:$0xff]  ;;  %v322_v48 = vld [vmem:[%s1499_s1 + $0x30] sm:$0xff]  ;;  %v329_v49 = vld [vmem:[%s1499_s1 + $0x68] sm:$0xff] }
  0x43   : > { %1082 = vmatmul.msk.f32.gmra.mxu2 %vm424_vm0, %v1541_v29  ;;  %473 = vmatpush.msra.mxu1 %v364_v30  ;;  %v363_v50 = vld [vmem:[%s1499_s1 + $0x178] sm:$0xff]  ;;  %v320_v51 = vld [vmem:[%s1499_s1 + $0x20] sm:$0xff]  ;;  %v354_v52 = vld [vmem:[%s1499_s1 + $0x130] sm:$0xff] }
  0x44   : > { %445 = vmatpush.msra.mxu0 %v330_v31  ;;  %557 = vmatpush.msrb.mxu2 %v371_v33  ;;  %v327_v53 = vld [vmem:[%s1499_s1 + $0x58] sm:$0xff]  ;;  %v361_v54 = vld [vmem:[%s1499_s1 + $0x168] sm:$0xff]  ;;  %v318_v55 = vld [vmem:[%s1499_s1 + $0x10] sm:$0xff] }
  0x45   : > { %474 = vmatpush.msra.mxu1 %v362_v34  ;;  %531 = vmatpush.msra.mxu3 %v333_v40  ;;  %v352_v56 = vld [vmem:[%s1499_s1 + $0x120] sm:$0xff]  ;;  %v325_v57 = vld [vmem:[%s1499_s1 + $0x48] sm:$0xff]  ;;  %v359_v58 = vld [vmem:[%s1499_s1 + $0x158] sm:$0xff] }
  0x46   : > { %446 = vmatpush.msra.mxu0 %v328_v35  ;;  %558 = vmatpush.msrb.mxu2 %v369_v37  ;;  %v316_v59 = vld [vmem:[%s1499_s1] sm:$0xff]  ;;  %v350_v60 = vld [vmem:[%s1499_s1 + $0x110] sm:$0xff]  ;;  %v323_v61 = vld [vmem:[%s1499_s1 + $0x38] sm:$0xff] }
  0x47   : > { %475 = vmatpush.msra.mxu1 %v360_v38  ;;  %532 = vmatpush.msra.mxu3 %v331_v44  ;;  %v357_v62 = vld [vmem:[%s1499_s1 + $0x148] sm:$0xff]  ;;  %v388_v63 = vld [vmem:[#allocation5] sm:$0xff]  ;;  %v1581_v0 = vld [vmem:[#allocation5 + $0x58] sm:$0xff] }
  0x48   : > { %447 = vmatpush.msra.mxu0 %v326_v39  ;;  %559 = vmatpush.msrb.mxu2 %v367_v41  ;;  %v348_v1 = vld [vmem:[%s1499_s1 + $0x100] sm:$0xff]  ;;  %v321_v2 = vld [vmem:[%s1499_s1 + $0x28] sm:$0xff]  ;;  %v355_v3 = vld [vmem:[%s1499_s1 + $0x138] sm:$0xff] }
  0x49   : > { %476 = vmatpush.msra.mxu1 %v358_v42  ;;  %533 = vmatpush.msra.mxu3 %v329_v49  ;;  %v389_v4 = vld [vmem:[#allocation5 + $0x8] sm:$0xff]  ;;  %v319_v6 = vld [vmem:[%s1499_s1 + $0x18] sm:$0xff]  ;;  %v392_v17 = vld [vmem:[#allocation5 + $0x20] sm:$0xff] }
  0x4a   : > { %448 = vmatpush.msra.mxu0 %v324_v43  ;;  %560 = vmatpush.msrb.mxu2 %v365_v45  ;;  %v401_v5 = vld [vmem:[%s1731_s2 + $0x8] sm:$0xff]  ;;  %v387_v9 = vld [vmem:[%s1499_s1 + $0x238] sm:$0xff]  ;;  %v400_v18 = vld [vmem:[%s1731_s2] sm:$0xff] }
  0x4b   : > { %477 = vmatpush.msra.mxu1 %v356_v46  ;;  %1083 = vmatmul.msk.f32.gmra.mxu2 %vm424_vm0, %v1562_v47  ;;  %v353_v7 = vld [vmem:[%s1499_s1 + $0x128] sm:$0xff]  ;;  %v351_v11 = vld [vmem:[%s1499_s1 + $0x118] sm:$0xff]  ;;  %v402_v21 = vld [vmem:[%s1731_s2 + $0x10] sm:$0xff] }
  0x4c   : > { %449 = vmatpush.msra.mxu0 %v322_v48  ;;  %561 = vmatpush.msrb.mxu2 %v363_v50  ;;  %v317_v10 = vld [vmem:[%s1499_s1 + $0x8] sm:$0xff]  ;;  %v403_v13 = vld [vmem:[%s1731_s2 + $0x18] sm:$0xff]  ;;  %v394_v22 = vld [vmem:[#allocation5 + $0x30] sm:$0xff] }
  0x4d   : > { %478 = vmatpush.msra.mxu1 %v354_v52  ;;  %534 = vmatpush.msra.mxu3 %v327_v53  ;;  %v349_v14 = vld [vmem:[%s1499_s1 + $0x108] sm:$0xff]  ;;  %v391_v15 = vld [vmem:[#allocation5 + $0x18] sm:$0xff]  ;;  %v398_v25 = vld [vmem:[#allocation5 + $0x50] sm:$0xff] }
  0x4e   : > { %450 = vmatpush.msra.mxu0 %v320_v51  ;;  %562 = vmatpush.msrb.mxu2 %v361_v54  ;;  %v385_v16 = vld [vmem:[%s1499_s1 + $0x228] sm:$0xff]  ;;  %v383_v19 = vld [vmem:[%s1499_s1 + $0x218] sm:$0xff] }
  0x4f   : > { %479 = vmatpush.msra.mxu1 %v352_v56  ;;  %535 = vmatpush.msra.mxu3 %v325_v57  ;;  %v381_v20 = vld [vmem:[%s1499_s1 + $0x208] sm:$0xff]  ;;  %v395_v23 = vld [vmem:[#allocation5 + $0x38] sm:$0xff]  ;;  %s1108_s1 = sshll.u32 %s1423_s28, 6 }
  0x50   : > { %451 = vmatpush.msra.mxu0 %v318_v55  ;;  %563 = vmatpush.msrb.mxu2 %v359_v58  ;;  %v397_v24 = vld [vmem:[#allocation5 + $0x48] sm:$0xff]  ;;  %s986_s13 = scalar_lea.hbm %s1736_s7, %s1108_s1 }
  0x51   : > { %480 = vmatpush.msra.mxu1 %v350_v60  ;;  %536 = vmatpush.msra.mxu3 %v323_v61  ;;  %s989_s16 = sshll.u32 %s986_s13, 4  ;;  %s990_s16 = int_to_ptr.hbm [resolvable:$true] %s989_s16 }
  0x52   : > { %452 = vmatpush.msra.mxu0 %v316_v59  ;;  %564 = vmatpush.msrb.mxu2 %v357_v62  ;;  %s1294_s28 = sshra.s32 %s990_s16, 4  ;;  %s1295_s28 = int_to_ptr.hbm [resolvable:$true] %s1294_s28 }
  0x53   : > { %453 = vmatmul.f32.vlgmr.msra.gmra.mxu0 %v388_v63  ;;  %1084 = vmatmul.msk.f32.gmra.mxu2 %vm424_vm0, %v1581_v0  ;;  %s1296_s18 = scalar_lea.hbm %s1295_s28, 64  ;;  %p1301_p11 = scmp.lt.s32.totalorder %s1295_s28, %s1736_s7 }
  0x54   : > { %481 = vmatpush.msra.mxu1 %v348_v1  ;;  %537 = vmatpush.msra.mxu3 %v321_v2  ;;  %p1297_p1 = scmp.ne.s32.totalorder %s1295_s28, %s1296_s18  ;;  %p1302_p9 = scmp.lt.s32.totalorder %s1300_s9, %s1296_s18 }
  0x55   : > { %565 = vmatpush.msrb.mxu2 %v355_v3  ;;  %1184 = vset.pattern.permute.xlu1 %v1357_v8 }
  0x56   : > { %482 = vmatmul.f32.vlgmr.msra.gmra.mxu1 %v389_v4  ;;  %411 = vperm.xlu1 %1184, %v401_v5   ;;  %p1298_p4 = pnand %p1297_p1, %p1469_p7  ;;  %p1303_p2 = por %p1302_p9, %p1301_p11 }
  0x57   : > { %538 = vmatpush.msra.mxu3 %v319_v6  ;;  %566 = vmatpush.msrb.mxu2 %v353_v7 }
  0x58   : > { %1183 = vset.pattern.permute.xlu0 %v1357_v8  ;;  %594 = vmatpush.msrb.mxu0 %v387_v9  ;;  %p1299_p8 = pneg %p1298_p4 }
  0x59   : > { %539 = vmatpush.msra.mxu3 %v317_v10  ;;  %567 = vmatpush.msrb.mxu2 %v351_v11 }
  0x5a   : > { %540 = vmatmul.f32.vlgmr.msra.gmra.mxu3 %v388_v63  ;;  %421 = vperm.xlu0 %1183, %v403_v13   ;;  %p1304_p10 = pnand %p1303_p2, %p1299_p8 }
  0x5b   : > { %568 = vmatpush.msrb.mxu2 %v349_v14  ;;  %456 = vmatmul.f32.gmra.mxu0 %v391_v15 }
  0x5c   : > { %569 = vmatmul.f32.vlgmr.msrb.gmra.mxu2 %v389_v4  ;;  %595 = vmatpush.msrb.mxu0 %v385_v16 }
  0x5d   : > { %1109 = vmatpush.msrb.mxu1 %v387_v9  ;;  %1185 = vset.pattern.permute.xlu2 %v1357_v8 }
  0x5e   : > { %485 = vmatmul.f32.gmra.mxu1 %v392_v17  ;;  %406 = vperm.xlu1 %1184, %v400_v18  }
  0x5f   : > { %596 = vmatpush.msrb.mxu0 %v383_v19  ;;  %1110 = vmatpush.msrb.mxu1 %v385_v16 }
  0x61   : > { %597 = vmatpush.msrb.mxu0 %v381_v20  ;;  %1111 = vmatpush.msrb.mxu1 %v383_v19 }
  0x62   : > { %543 = vmatmul.f32.gmra.mxu3 %v391_v15  ;;  %416 = vperm.xlu0 %1183, %v402_v21  }
  0x63   : > { %459 = vmatmul.f32.gmra.mxu0 %v394_v22  ;;  %1112 = vmatpush.msrb.mxu1 %v381_v20 }
  0x64   : > { %572 = vmatmul.f32.gmra.mxu2 %v392_v17 }
  0x66   : > { %488 = vmatmul.f32.gmra.mxu1 %v395_v23 }
  0x6a   : > { %546 = vmatmul.f32.gmra.mxu3 %v394_v22 }
  0x6b   : > { %462 = vmatmul.f32.gmra.mxu0 %v397_v24 }
  0x6c   : > { %575 = vmatmul.f32.gmra.mxu2 %v395_v23 }
  0x6e   : > { %491 = vmatmul.f32.gmra.mxu1 %v398_v25 }
  0x72   : > { %549 = vmatmul.f32.gmra.mxu3 %v397_v24 }
  0x73   : > { %1085 = vmatmul.msk.f32.vlgmr.msrb.gmra.mxu0 %vm424_vm0, %v1521_v12 }
  0x74   : > { %578 = vmatmul.f32.gmra.mxu2 %v398_v25  ;;  %v696_v25 = vld [vmem:[%s1735_s6] sm:$0xff] }
  0x76   : > { %1088 = vmatmul.msk.f32.vlgmr.msrb.gmra.mxu1 %vm424_vm0, %v1581_v0 }
  0x7b   : > { %1086 = vmatmul.msk.f32.gmra.mxu0 %vm424_vm0, %v1541_v29 }
  0x83   : > { %1087 = vmatmul.msk.f32.gmra.mxu0 %vm424_vm0, %v1562_v47 }
  0xbe   : > { %v512_v26 = vpop.f32.mrf.mxu2 }
  0xc6   : > { %v515_v27 = vpop.f32.mrf.mxu2 }
  0xc8   : > { %v412_v29 = vpop.permute.xlu1 %411 }
  0xcc   : > { %v422_v42 = vpop.permute.xlu0 %421 }
  0xce   : > { %v1617_v28 = vpop.f32.mrf.mxu2 }
  0xd0   : > { %v454_v30 = vpop.f32.mrf.mxu0  ;;  %v407_v51 = vpop.permute.xlu1 %406 }
  0xd1   : > { %v455_v58 = vadd.f32 %v454_v30, %v407_v51  ;;  %v697_v30 = vld [vmem:[%s1735_s6 + $0x8] sm:$0xff] }
  0xd3   : > { %v483_v31 = vpop.f32.mrf.mxu1 }
  0xd4   : > { %v484_v3 = vadd.f32 %v483_v31, %v455_v58  ;;  %v417_v15 = vpop.permute.xlu0 %416  ;;  %v661_v58 = vld [vmem:[%s1732_s3] sm:$0x3] }
  0xd6   : > { %v521_v32 = vpop.f32.mrf.mxu2  ;;  %v513_v11 = vadd.f32 %v512_v26, %v484_v3  ;;  %v693_v3 = vld [vmem:[%s1734_s5 + $0x8] sm:$0xff] }
  0xd8   : > { %v457_v33 = vpop.f32.mrf.mxu0  ;;  %v1635_v14 = vmax.f32 %v513_v11, 0.0 }
  0xd9   : > { %v458_v43 = vadd.f32 %v457_v33, %v412_v29 }
  0xdb   : > { %v486_v34 = vpop.f32.mrf.mxu1 }
  0xdc   : > { %v487_v48 = vadd.f32 %v486_v34, %v458_v43  ;;  %v1358_v34 = vmov 256.0  }
  0xdd   : > { %v541_v12 = vpop.f32.mrf.mxu3  ;;  %1186 = vrcp.f32 %v1358_v34 }
  0xde   : > { %v516_v54 = vadd.f32 %v515_v27, %v487_v48  ;;  %v542_v59 = vadd.f32 %v541_v12, %v407_v51  ;;  %v698_v48 = vld [vmem:[%s1735_s6 + $0x10] sm:$0xff] }
  0xdf   : > { %v570_v35 = vpop.f32.mrf.mxu2 }
  0xe0   : > { %v460_v36 = vpop.f32.mrf.mxu0  ;;  %v1619_v1 = vmax.f32 %v516_v54, 0.0  ;;  %v571_v4 = vadd.f32 %v570_v35, %v542_v59 }
  0xe1   : > { %v461_v17 = vadd.f32 %v460_v36, %v417_v15 }
  0xe3   : > { %v489_v37 = vpop.f32.mrf.mxu1  ;;  %v1187_v12 = vpop.eup %1186 }
  0xe4   : > { %v490_v20 = vadd.f32 %v489_v37, %v461_v17  ;;  %v632_v35 = vmul.f32 256.0, %v1187_v12  ;;  %vm636_vm1 = vweird.f32 %v1187_v12 }
  0xe5   : > { %v544_v38 = vpop.f32.mrf.mxu3 }
  0xe6   : > { %v545_v49 = vadd.f32 %v544_v38, %v412_v29  ;;  %v519_v24 = vadd.f32 %v1617_v28, %v490_v20  ;;  %v699_v28 = vld [vmem:[%s1735_s6 + $0x18] sm:$0xff]  ;;  %v633_v36 = vsub.f32 1.0, %v632_v35  ;;  %v654_v38 = vlaneseq }
  0xe7   : > { %v573_v39 = vpop.f32.mrf.mxu2 }
  0xe8   : > { %v463_v40 = vpop.f32.mrf.mxu0  ;;  %v574_v55 = vadd.f32 %v573_v39, %v545_v49  ;;  %v1647_v27 = vmax.f32 %v519_v24, 0.0  ;;  %v634_v37 = vmul.f32 %v1187_v12, %v633_v36 }
  0xe9   : > { %v464_v46 = vadd.f32 %v463_v40, %v422_v42  ;;  %v655_v40 = vand.u32 127, %v654_v38 }
  0xea   : > { %v635_v39 = vadd.f32 %v1187_v12, %v634_v37 }
  0xeb   : > { %v492_v44 = vpop.f32.mrf.mxu1  ;;  %vm656_vm2 = vcmp.eq.s32.totalorder %v655_v40, 0 }
  0xec   : > { %v493_v50 = vadd.f32 %v492_v44, %v464_v46  ;;  %v637_v29 = vsel %vm636_vm1, %v1187_v12, %v635_v39  ;;  %v662_v46 = vld [vmem:[%s1733_s4] sm:$0x3] }
  0xed   : > { %v547_v41 = vpop.f32.mrf.mxu3 }
  0xee   : > { %v522_v60 = vadd.f32 %v521_v32, %v493_v50  ;;  %v548_v18 = vadd.f32 %v547_v41, %v417_v15 }
  0xef   : > { %v576_v45 = vpop.f32.mrf.mxu2 }
  0xf0   : > { %v599_v47 = vpop.f32.mrf.mxu0  ;;  %v1623_v5 = vmax.f32 %v522_v60, 0.0  ;;  %v577_v21 = vadd.f32 %v576_v45, %v548_v18 }
  0xf1   : > { %v600_v8 = vadd.f32 %v599_v47, %v571_v4  ;;  %v694_v4 = vld [vmem:[%s1734_s5 + $0x10] sm:$0xff] }
  0xf3   : > { %v608_v57 = vpop.f32.mrf.mxu1  ;;  %v1633_v13 = vmax.f32 %v600_v8, 0.0 }
  0xf5   : > { %v550_v52 = vpop.f32.mrf.mxu3  ;;  %v619_v16 = vadd.f32 %v1633_v13, %v1635_v14  ;;  %v642_v33 = vmax.f32 %v1635_v14, %v1633_v13 }
  0xf6   : > { %v551_v53 = vadd.f32 %v550_v52, %v422_v42 }
  0xf7   : > { %v579_v56 = vpop.f32.mrf.mxu2 }
  0xf8   : > { %v580_v61 = vadd.f32 %v579_v56, %v551_v53  ;;  %v602_v62 = vpop.f32.mrf.mxu0 }
  0xf9   : > { %v603_v63 = vadd.f32 %v602_v62, %v574_v55 }
  0xfa   : > { %v609_v0 = vadd.f32 %v608_v57, %v580_v61 }
  0xfb   : > { %v1621_v2 = vmax.f32 %v603_v63, 0.0 }
  0xfc   : > { %v1625_v6 = vmax.f32 %v609_v0, 0.0  ;;  %v692_v0 = vld [vmem:[%s1734_s5] sm:$0xff] }
  0xfd   : > { %v622_v7 = vadd.f32 %v1621_v2, %v1619_v1  ;;  %v645_v23 = vmax.f32 %v1619_v1, %v1621_v2 }
  0xfe   : > { %v651_v9 = vmax.f32 %v1623_v5, %v1625_v6  ;;  %v628_v10 = vadd.f32 %v1625_v6, %v1623_v5 }
  0xff   : > { %623 = vadd.xlane.f32.xlu1 %v622_v7  ;;  %v695_v7 = vld [vmem:[%s1734_s5 + $0x18] sm:$0xff] }
 0x100   : > { %652 = vmax.xlane.f32.xlu0 %v651_v9  ;;  %629 = vadd.xlane.f32.xlu2 %v628_v10  ;;  %v605_v19 = vpop.f32.mrf.mxu0 }
 0x101   : > { %v606_v22 = vadd.f32 %v605_v19, %v577_v21 }
 0x103   : > { %v1645_v26 = vmax.f32 %v606_v22, 0.0 }
 0x105   : > { %v625_v31 = vadd.f32 %v1645_v26, %v1647_v27  ;;  %v648_v32 = vmax.f32 %v1647_v27, %v1645_v26 }
 0x108   : > { %620 = vadd.xlane.f32.xlu2 %v619_v16 }
 0x110   : > { %646 = vmax.xlane.f32.xlu2 %v645_v23 }
 0x114   : > { %702 = vperm.xlu0 %1183, %v696_v25  }
 0x118   : > { %626 = vadd.xlane.f32.xlu2 %v625_v31  ;;  %707 = vperm.xlu1 %1184, %v697_v30  }
 0x11c   : > { %717 = vperm.xlu0 %1183, %v699_v28  }
 0x120   : > { %649 = vmax.xlane.f32.xlu2 %v648_v32 }
 0x128   : > { %643 = vmax.xlane.f32.xlu2 %v642_v33 }
 0x140   : > { %665 = vperm.xlu2 %1185, %v662_v46  }
 0x148   : > { %712 = vperm.xlu2 %1185, %v698_v48  }
 0x172   : > { %v624_v50 = vpop.xlane.xlu1 %623 }
 0x173   : > { %v630_v41 = vpop.xlane.xlu2 %629  ;;  %v653_v43 = vpop.xlane.xlu0 %652  ;;  %v639_v53 = vmul.f32 %v637_v29, %v624_v50 }
 0x174   : > { %v641_v42 = vmul.f32 %v637_v29, %v630_v41 }
 0x176   : > { %v660_v44 = vsel %vm656_vm2, %v641_v42, %v653_v43 }
 0x177   : > { %683 = vmatpush.msra.mxu1 %v660_v44 }
 0x17b   : > { %v621_v45 = vpop.xlane.xlu2 %620 }
 0x17c   : > { %v638_v56 = vmul.f32 %v637_v29, %v621_v45 }
 0x183   : > { %v647_v47 = vpop.xlane.xlu2 %646 }
 0x184   : > { %v658_v55 = vsel %vm656_vm2, %v639_v53, %v647_v47 }
 0x186   : > { %v703_v8 = vpop.permute.xlu0 %702 }
 0x18a   : > { %v708_v9 = vpop.permute.xlu1 %707 }
 0x18b   : > { %v627_v49 = vpop.xlane.xlu2 %626 }
 0x18c   : > { %v640_v51 = vmul.f32 %v637_v29, %v627_v49 }
 0x18e   : > { %v718_v31 = vpop.permute.xlu0 %717 }
 0x193   : > { %v650_v52 = vpop.xlane.xlu2 %649 }
 0x194   : > { %v659_v54 = vsel %vm656_vm2, %v640_v51, %v650_v52 }
 0x195   : > { %684 = vmatpush.msra.mxu1 %v659_v54 }
 0x197   : > { %685 = vmatpush.msra.mxu1 %v658_v55 }
 0x19b   : > { %v644_v57 = vpop.xlane.xlu2 %643 }
 0x19c   : > { %v657_v59 = vsel %vm656_vm2, %v638_v56, %v644_v57 }
 0x19d   : > { %686 = vmatpush.msra.mxu1 %v657_v59 }
 0x19e   : > { %1089 = vmatmul.msk.f32.vlgmr.msra.gmra.mxu1 %vm424_vm0, %v661_v58 }
 0x1a3   : > { %v666_v60 = vpop.permute.xlu2 %665 }
 0x1ab   : > { %v713_v19 = vpop.permute.xlu2 %712 }
 0x21b   : > { %v688_v61 = vpop.f32.mrf.mxu1 }
 0x21c   : > { %v689_v62 = vadd.f32 %v688_v61, %v666_v60 }
 0x21e   : > { %v691_v63 = vmax.f32 %v689_v62, 0.0 }
 0x220   : > { %1090 = vmatpush.msk.msra.mxu2 %vm733_vm3, %v691_v63  ;;  %1113 = vmatpush.msk.msrb.mxu3 %vm733_vm3, %v691_v63 }
 0x221   : > { %1091 = vmatmul.msk.f32.vlgmr.msra.gmra.mxu2 %vm720_vm4, %v692_v0  ;;  %1092 = vmatmul.msk.f32.vlgmr.msrb.gmra.mxu3 %vm720_vm4, %v693_v3 }
 0x229   : > { %1093 = vmatmul.msk.f32.gmra.mxu3 %vm720_vm4, %v694_v4 }
 0x231   : > { %1094 = vmatmul.msk.f32.gmra.mxu3 %vm720_vm4, %v695_v7 }
 0x2a4   : > { %v754_v10 = vpop.f32.mrf.mxu2  ;;  %v757_v11 = vpop.f32.mrf.mxu3 }
 0x2a5   : > { %v755_v15 = vadd.f32 %v754_v10, %v703_v8  ;;  %v758_v16 = vadd.f32 %v757_v11, %v708_v9 }
 0x2a7   : > { %v1095_v17 = vmul.f32 -1.442695, %v755_v15  ;;  %v1096_v18 = vmul.f32 -1.442695, %v758_v16 }
 0x2a9   : > { %1188 = vpow2.f32 %v1095_v17 }
 0x2aa   : > { %1190 = vpow2.f32 %v1096_v18 }
 0x2ac   : > { %v760_v20 = vpop.f32.mrf.mxu3 }
 0x2ad   : > { %v761_v21 = vadd.f32 %v760_v20, %v713_v19 }
 0x2af   : > { %v1189_v22 = vpop.eup %1188  ;;  %v1097_v23 = vmul.f32 -1.442695, %v761_v21 }
 0x2b0   : > { %v1191_v24 = vpop.eup %1190  ;;  %v778_v25 = vadd.f32 1.0, %v1189_v22 }
 0x2b1   : > { %v779_v30 = vadd.f32 1.0, %v1191_v24  ;;  %1192 = vpow2.f32 %v1097_v23 }
 0x2b2   : > { %1194 = vrcp.f32 %v778_v25  ;;  %v793_v29 = vand.u32 2147483648, %v778_v25  ;;  %v791_v43 = vand.u32 2147483647, %v778_v25  ;;  %vm787_vm7 = vweird.f32 %v778_v25 }
 0x2b3   : > { %1196 = vrcp.f32 %v779_v30  ;;  %v808_v41 = vand.u32 2147483648, %v779_v30  ;;  %v806_v45 = vand.u32 2147483647, %v779_v30  ;;  %vm802_vm8 = vweird.f32 %v779_v30 }
 0x2b4   : > { %v763_v28 = vpop.f32.mrf.mxu3  ;;  %v794_v51 = vor.u32 1.1754944e-38, %v793_v29  ;;  %vm792_vm11 = vcmp.eq.f32.partialorder %v791_v43, 8.507059e+37 }
 0x2b5   : > { %v764_v32 = vadd.f32 %v763_v28, %v718_v31  ;;  %v809_v52 = vor.u32 1.1754944e-38, %v808_v41  ;;  %vm807_vm12 = vcmp.eq.f32.partialorder %v806_v45, 8.507059e+37 }
 0x2b7   : > { %v1193_v33 = vpop.eup %1192  ;;  %v1098_v34 = vmul.f32 -1.442695, %v764_v32 }
 0x2b8   : > { %v1195_v12 = vpop.eup %1194  ;;  %v780_v35 = vadd.f32 1.0, %v1193_v33 }
 0x2b9   : > { %v1197_v36 = vpop.eup %1196  ;;  %1198 = vpow2.f32 %v1098_v34  ;;  %v783_v37 = vmul.f32 %v1195_v12, %v778_v25  ;;  %vm788_vm5 = vweird.f32 %v1195_v12 }
 0x2ba   : > { %1200 = vrcp.f32 %v780_v35  ;;  %v798_v38 = vmul.f32 %v1197_v36, %v779_v30  ;;  %vm803_vm6 = vweird.f32 %v1197_v36  ;;  %vm789_vm9 = vmor %vm787_vm7, %vm788_vm5  ;;  %v823_v59 = vand.u32 2147483648, %v780_v35 }
 0x2bb   : > { %v784_v39 = vsub.f32 1.0, %v783_v37  ;;  %vm804_vm10 = vmor %vm802_vm8, %vm803_vm6  ;;  %v821_v61 = vand.u32 2147483647, %v780_v35  ;;  %vm817_vm14 = vweird.f32 %v780_v35 }
 0x2bc   : > { %v799_v40 = vsub.f32 1.0, %v798_v38  ;;  %v824_v0 = vor.u32 1.1754944e-38, %v823_v59 }
 0x2bd   : > { %v785_v42 = vmul.f32 %v1195_v12, %v784_v39  ;;  %vm822_vm0 = vcmp.eq.f32.partialorder %v821_v61, 8.507059e+37 }
 0x2be   : > { %v800_v44 = vmul.f32 %v1197_v36, %v799_v40 }
 0x2bf   : > { %v1199_v46 = vpop.eup %1198  ;;  %v786_v47 = vadd.f32 %v1195_v12, %v785_v42 }
 0x2c0   : > { %v1201_v48 = vpop.eup %1200  ;;  %v781_v49 = vadd.f32 1.0, %v1199_v46  ;;  %v801_v50 = vadd.f32 %v1197_v36, %v800_v44 }
 0x2c1   : > { %v790_v53 = vsel %vm789_vm9, %v1195_v12, %v786_v47  ;;  %v813_v54 = vmul.f32 %v1201_v48, %v780_v35  ;;  %vm818_vm13 = vweird.f32 %v1201_v48 }
 0x2c2   : > { %1202 = vrcp.f32 %v781_v49  ;;  %v805_v55 = vsel %vm804_vm10, %v1197_v36, %v801_v50  ;;  %v795_v56 = vsel %vm792_vm11, %v794_v51, %v790_v53  ;;  %vm819_vm15 = vmor %vm817_vm14, %vm818_vm13  ;;  %v838_v9 = vand.u32 2147483648, %v781_v49 }
 0x2c3   : > { %v810_v57 = vsel %vm807_vm12, %v809_v52, %v805_v55  ;;  %846 = vrot.lane.b32.xlu2 %v795_v56, %s1359_s29  ;;  %v814_v58 = vsub.f32 1.0, %v813_v54  ;;  %v836_v11 = vand.u32 2147483647, %v781_v49  ;;  %vm832_vm2 = vweird.f32 %v781_v49 }
 0x2c4   : > { %848 = vrot.lane.b32.xlu1 %v810_v57, %s1359_s29  ;;  %v839_v16 = vor.u32 1.1754944e-38, %v838_v9 }
 0x2c5   : > { %v815_v60 = vmul.f32 %v1201_v48, %v814_v58  ;;  %vm837_vm4 = vcmp.eq.f32.partialorder %v836_v11, 8.507059e+37 }
 0x2c7   : > { %v816_v62 = vadd.f32 %v1201_v48, %v815_v60 }
 0x2c8   : > { %v1203_v63 = vpop.eup %1202 }
 0x2c9   : > { %v820_v3 = vsel %vm819_vm15, %v1201_v48, %v816_v62  ;;  %v828_v4 = vmul.f32 %v1203_v63, %v781_v49  ;;  %vm833_vm1 = vweird.f32 %v1203_v63 }
 0x2ca   : > { %v825_v7 = vsel %vm822_vm0, %v824_v0, %v820_v3  ;;  %vm834_vm3 = vmor %vm832_vm2, %vm833_vm1 }
 0x2cb   : > { %850 = vrot.lane.b32.xlu0 %v825_v7, %s1359_s29  ;;  %v829_v8 = vsub.f32 1.0, %v828_v4 }
 0x2cd   : > { %v830_v10 = vmul.f32 %v1203_v63, %v829_v8 }
 0x2cf   : > { %v831_v15 = vadd.f32 %v1203_v63, %v830_v10 }
 0x2d1   : > { %v835_v17 = vsel %vm834_vm3, %v1203_v63, %v831_v15 }
 0x2d2   : > { %v840_v18 = vsel %vm837_vm4, %v839_v16, %v835_v17 }
 0x2d3   : > { %852 = vrot.lane.b32.xlu2 %v840_v18, %s1359_s29 }
 0x31d   : > { %v847_v19 = vpop.permute.xlu2 %846 }
 0x31e   : > { %v858_v20 = vadd.f32 %v847_v19, %v795_v56 }
 0x320   : > { %v1099_v21 = vmul.f32 -1.442695, %v858_v20 }
 0x322   : > { %1204 = vpow2.f32 %v1099_v21 }
 0x328   : > { %v1205_v22 = vpop.eup %1204 }
 0x329   : > { %v874_v23 = vadd.f32 1.0, %v1205_v22 }
 0x32b   : > { %1206 = vrcp.f32 %v874_v23  ;;  %v889_v33 = vand.u32 2147483648, %v874_v23  ;;  %v887_v35 = vand.u32 2147483647, %v874_v23  ;;  %vm883_vm6 = vweird.f32 %v874_v23 }
 0x32d   : > { %v853_v24 = vpop.permute.xlu2 %852  ;;  %v890_v29 = vor.u32 1.1754944e-38, %v889_v33  ;;  %vm888_vm8 = vcmp.eq.f32.partialorder %v887_v35, 8.507059e+37 }
 0x32e   : > { %v861_v25 = vadd.f32 %v853_v24, %v840_v18 }
 0x330   : > { %v1102_v30 = vmul.f32 -1.442695, %v861_v25 }
 0x331   : > { %v1207_v31 = vpop.eup %1206 }
 0x332   : > { %1208 = vpow2.f32 %v1102_v30  ;;  %v879_v28 = vmul.f32 %v1207_v31, %v874_v23  ;;  %vm884_vm5 = vweird.f32 %v1207_v31 }
 0x333   : > { %vm885_vm7 = vmor %vm883_vm6, %vm884_vm5 }
 0x334   : > { %v880_v32 = vsub.f32 1.0, %v879_v28 }
 0x336   : > { %v849_v34 = vpop.permute.xlu1 %848  ;;  %v881_v12 = vmul.f32 %v1207_v31, %v880_v32 }
 0x337   : > { %v859_v36 = vadd.f32 %v849_v34, %v810_v57 }
 0x338   : > { %v1209_v37 = vpop.eup %1208  ;;  %v882_v38 = vadd.f32 %v1207_v31, %v881_v12 }
 0x339   : > { %v877_v39 = vadd.f32 1.0, %v1209_v37  ;;  %v1100_v40 = vmul.f32 -1.442695, %v859_v36 }
 0x33a   : > { %v886_v41 = vsel %vm885_vm7, %v1207_v31, %v882_v38 }
 0x33b   : > { %1210 = vrcp.f32 %v877_v39  ;;  %v891_v42 = vsel %vm888_vm8, %v890_v29, %v886_v41  ;;  %v934_v51 = vand.u32 2147483648, %v877_v39  ;;  %v932_v53 = vand.u32 2147483647, %v877_v39 }
 0x33c   : > { %1212 = vpow2.f32 %v1100_v40  ;;  %940 = vperm.xlu1 %1184, %v891_v42   ;;  %vm928_vm10 = vweird.f32 %v877_v39 }
 0x33d   : > { %v851_v43 = vpop.permute.xlu0 %850  ;;  %v935_v57 = vor.u32 1.1754944e-38, %v934_v51  ;;  %vm933_vm12 = vcmp.eq.f32.partialorder %v932_v53, 8.507059e+37 }
 0x33e   : > { %v860_v44 = vadd.f32 %v851_v43, %v825_v7 }
 0x340   : > { %v1101_v45 = vmul.f32 -1.442695, %v860_v44 }
 0x341   : > { %v1211_v46 = vpop.eup %1210 }
 0x342   : > { %v1213_v47 = vpop.eup %1212  ;;  %1214 = vpow2.f32 %v1101_v45  ;;  %v924_v48 = vmul.f32 %v1211_v46, %v877_v39  ;;  %vm929_vm9 = vweird.f32 %v1211_v46 }
 0x343   : > { %v875_v49 = vadd.f32 1.0, %v1213_v47  ;;  %vm930_vm11 = vmor %vm928_vm10, %vm929_vm9 }
 0x344   : > { %v925_v50 = vsub.f32 1.0, %v924_v48 }
 0x345   : > { %1216 = vrcp.f32 %v875_v49  ;;  %v904_v63 = vand.u32 2147483648, %v875_v49  ;;  %v902_v3 = vand.u32 2147483647, %v875_v49  ;;  %vm898_vm14 = vweird.f32 %v875_v49 }
 0x346   : > { %v926_v52 = vmul.f32 %v1211_v46, %v925_v50 }
 0x347   : > { %v905_v9 = vor.u32 1.1754944e-38, %v904_v63  ;;  %vm903_vm0 = vcmp.eq.f32.partialorder %v902_v3, 8.507059e+37 }
 0x348   : > { %v1215_v54 = vpop.eup %1214  ;;  %v927_v55 = vadd.f32 %v1211_v46, %v926_v52 }
 0x349   : > { %v876_v56 = vadd.f32 1.0, %v1215_v54 }
 0x34a   : > { %v931_v58 = vsel %vm930_vm11, %v1211_v46, %v927_v55 }
 0x34b   : > { %v1217_v59 = vpop.eup %1216  ;;  %1218 = vrcp.f32 %v876_v56  ;;  %v936_v60 = vsel %vm933_vm12, %v935_v57, %v931_v58  ;;  %v919_v16 = vand.u32 2147483648, %v876_v56  ;;  %v917_v18 = vand.u32 2147483647, %v876_v56 }
 0x34c   : > { %955 = vperm.xlu1 %1184, %v936_v60   ;;  %v894_v61 = vmul.f32 %v1217_v59, %v875_v49  ;;  %vm899_vm13 = vweird.f32 %v1217_v59  ;;  %vm913_vm2 = vweird.f32 %v876_v56 }
 0x34d   : > { %vm900_vm15 = vmor %vm898_vm14, %vm899_vm13  ;;  %v920_v20 = vor.u32 1.1754944e-38, %v919_v16  ;;  %vm918_vm4 = vcmp.eq.f32.partialorder %v917_v18, 8.507059e+37 }
 0x34e   : > { %v895_v62 = vsub.f32 1.0, %v894_v61 }
 0x350   : > { %v896_v0 = vmul.f32 %v1217_v59, %v895_v62 }
 0x351   : > { %v1219_v4 = vpop.eup %1218 }
 0x352   : > { %v897_v7 = vadd.f32 %v1217_v59, %v896_v0  ;;  %v909_v8 = vmul.f32 %v1219_v4, %v876_v56  ;;  %vm914_vm1 = vweird.f32 %v1219_v4 }
 0x353   : > { %vm915_vm3 = vmor %vm913_vm2, %vm914_vm1 }
 0x354   : > { %v901_v10 = vsel %vm900_vm15, %v1217_v59, %v897_v7  ;;  %v910_v11 = vsub.f32 1.0, %v909_v8 }
 0x355   : > { %v906_v15 = vsel %vm903_vm0, %v905_v9, %v901_v10 }
 0x356   : > { %945 = vperm.xlu0 %1183, %v906_v15   ;;  %v911_v17 = vmul.f32 %v1219_v4, %v910_v11 }
 0x358   : > { %v912_v19 = vadd.f32 %v1219_v4, %v911_v17 }
 0x35a   : > { %v916_v21 = vsel %vm915_vm3, %v1219_v4, %v912_v19 }
 0x35b   : > { %v921_v22 = vsel %vm918_vm4, %v920_v20, %v916_v21 }
 0x35c   : > { %950 = vperm.xlu2 %1185, %v921_v22  }
 0x3ae   : > { %v941_v23 = vpop.permute.xlu1 %940 }
 0x3af   : > { %v958_v24 = vmul.f32 %v941_v23, %v1635_v14  ;;  %v959_v25 = vmul.f32 %v941_v23, %v1633_v13 }
 0x3b1   : > { %966 = vst [vmem:[%s315_s20] sm:$0xff] %v958_v24 }
 0x3b2   : > { %967 = vst [vmem:[%s315_s20 + $0x8] sm:$0xff] %v959_v25 }
 0x3b6   : > { %v951_v30 = vpop.permute.xlu2 %950 }
 0x3b7   : > { %v962_v31 = vmul.f32 %v951_v30, %v1647_v27  ;;  %v963_v28 = vmul.f32 %v951_v30, %v1645_v26 }
 0x3b9   : > { %970 = vst [vmem:[%s315_s20 + $0x20] sm:$0xff] %v962_v31 }
 0x3ba   : > { %971 = vst [vmem:[%s315_s20 + $0x28] sm:$0xff] %v963_v28 }
 0x3be   : > { %v956_v32 = vpop.permute.xlu1 %955 }
 0x3bf   : > { %v964_v33 = vmul.f32 %v956_v32, %v1623_v5  ;;  %v965_v34 = vmul.f32 %v956_v32, %v1625_v6 }
 0x3c1   : > { %972 = vst [vmem:[%s315_s20 + $0x30] sm:$0xff] %v964_v33 }
 0x3c2   : > { %973 = vst [vmem:[%s315_s20 + $0x38] sm:$0xff] %v965_v34 }
 0x3c8   : > { %v946_v13 = vpop.permute.xlu0 %945 }
 0x3c9   : > { %v960_v14 = vmul.f32 %v946_v13, %v1619_v1  ;;  %v961_v26 = vmul.f32 %v946_v13, %v1621_v2 }
 0x3cb   : > { %968 = vst [vmem:[%s315_s20 + $0x10] sm:$0xff] %v960_v14 }
 0x3cc   : > { %969 = vst [vmem:[%s315_s20 + $0x18] sm:$0xff] %v961_v26 }
 0x3cd   : > { %1307 = shalt.err (!%p1304_p10)
}
 0x3ce   : > { %s1360_s11 = smov 256   ;;  %s1361_s29 = smov 16  }
 0x3cf   : > { %1123 = dma.vmem_to_hbm [thread:$0]  (%p1469_p7), %s988_s14, 1024, %s990_s16, %s975_s17, %s1360_s11, %s1360_s11, %s1361_s29  }
 0x3d0 PF: > { %s1004_s26 = sand.u32 1, %s1338_s24   ;;  %p1747_p12 = scmp.ge.s32.totalorder %s1350_s27, 2 }
 0x3d1   : > { %s1005_s20 = scalar_lea.sflag [#allocation4], %s1004_s26 }
 0x3d2   : > { %p1134_p13 = pnand %p1747_p12, %p1437_p6 }
 0x3d4   : > { %p1135_p0 = pneg %p1134_p13 }
 0x3d6   : > { %1333 = dma.done.wait (%p1135_p0), %s1005_s20, 1024  }
 0x3d7   : > { %1335 = vsyncadd (%p1135_p0), %s1005_s20, 4294966272  ;;  %s1748_s1 = sld [smem:[#allocation11_spill]]  ;;  %p21_p3 = scmp.ge.s32.totalorder %s1455_s15, 4  }
 0x3d8   : > { %s1749_s26 = sld [smem:[#allocation12_spill]]  ;;  %s1750_s24 = smov %s1342_s25 }
 0x3d9   : > { %s1752_s27 = smov %s1455_s15  ;;  %23 = sbr.rel (!%p21_p3) target bundleno = 8 (0x8), region = 97 }
 0x3dd   : > { %s1751_s25 = smov %s1748_s1 }
 0x3de   :  { %1011 = vsyncpa [#allocation3], 1 }
 0x3df   :  { %1013 = vsyncpa [#allocation3 + $0x1], 1 }
 0x3e0   :  { %1014 = vsyncpa [#allocation6], 1 }
 0x3e1   :  { %1015 = vsyncpa [#allocation4], 1 }
 0x3e2   :  { %1017 = vsyncpa [#allocation4 + $0x1], 1 }

</bundles_post_ra>
